<compile_context>
chip_gen: v7x
topology: tpu7x:2x2x1
jax: 0.10.0
libtpu: 0.0.40
codegen_flags: <defaults>
</compile_context>

<pallas_src>
import functools
import math

import jax
import jax.numpy as jnp
from jax.experimental import pallas as pl
from jax.experimental.pallas import tpu as pltpu


def _round_up(x: int, m: int) -> int:
    return ((x + m - 1) // m) * m


# ---------------------------------------------------------------------------
# Kernel 1: tiled fused linear layer  y = x @ W + b   (c_attn and c_proj)
# ---------------------------------------------------------------------------
def _linear_kernel(x_ref, w_ref, b_ref, o_ref, acc_ref):
    k = pl.program_id(2)

    @pl.when(k == 0)
    def _init():
        acc_ref[...] = jnp.zeros_like(acc_ref)

    acc_ref[...] += jnp.dot(x_ref[...], w_ref[...],
                            preferred_element_type=jnp.float32)

    @pl.when(k == pl.num_programs(2) - 1)
    def _finalize():
        o_ref[...] = (acc_ref[...] + b_ref[...]).astype(o_ref.dtype)


def linear(x2d, w, b, *, compute_dtype=jnp.bfloat16, out_dtype=jnp.float32,
           tm=256, tn=256, tk=512):
    """x2d: (M, K), w: (K, N), b: (N,) -> (M, N) in out_dtype (f32 accumulation)."""
    M, K = x2d.shape
    K2, N = w.shape
    assert K == K2

    # Clamp tiles to the (padded) problem; tiles stay (8,128)-aligned.
    tm = min(tm, _round_up(M, 8))
    tn = min(tn, _round_up(N, 128))
    tk = min(tk, _round_up(K, 128))
    Mp, Kp, Np = _round_up(M, tm), _round_up(K, tk), _round_up(N, tn)

    xp = jnp.pad(x2d, ((0, Mp - M), (0, Kp - K))).astype(compute_dtype)
    wp = jnp.pad(w, ((0, Kp - K), (0, Np - N))).astype(compute_dtype)
    bp = jnp.pad(b, (0, Np - N)).reshape(1, Np).astype(jnp.float32)

    out = pl.pallas_call(
        _linear_kernel,
        out_shape=jax.ShapeDtypeStruct((Mp, Np), out_dtype),
        grid_spec=pltpu.PrefetchScalarGridSpec(
            num_scalar_prefetch=0,
            grid=(Mp // tm, Np // tn, Kp // tk),
            in_specs=[
                pl.BlockSpec((tm, tk), lambda i, j, k: (i, k)),
                pl.BlockSpec((tk, tn), lambda i, j, k: (k, j)),
                pl.BlockSpec((1, tn), lambda i, j, k: (0, j)),
            ],
            out_specs=pl.BlockSpec((tm, tn), lambda i, j, k: (i, j)),
            scratch_shapes=[pltpu.VMEM((tm, tn), jnp.float32)],
        ),
        compiler_params=pltpu.CompilerParams(
            dimension_semantics=("parallel", "parallel", "arbitrary"),
            vmem_limit_bytes=32 * 1024 * 1024,
        ),
    )(xp, wp, bp)
    return out[:M, :N]


# ---------------------------------------------------------------------------
# Kernel 2: flash-style causal multi-head attention on (B, T, C) slabs
# ---------------------------------------------------------------------------
def _flash_mha_kernel(q_ref, k_ref, v_ref, o_ref, m_sc, l_sc, acc_sc, *,
                      n_head, sm_scale):
    # q_ref: (1, tq, C); k_ref, v_ref: (1, tk, C); o_ref: (1, tq, C)
    # m_sc, l_sc: (H, tq, 1) f32; acc_sc: (H, tq, hd) f32
    qi = pl.program_id(1)
    ki = pl.program_id(2)

    @pl.when(ki == 0)
    def _init():
        m_sc[...] = jnp.full_like(m_sc, -jnp.inf)
        l_sc[...] = jnp.zeros_like(l_sc)
        acc_sc[...] = jnp.zeros_like(acc_sc)

    @pl.when(ki <= qi)          # skip kv blocks entirely above the causal diagonal
    def _body():
        tq, C = q_ref.shape[1], q_ref.shape[2]
        tk = k_ref.shape[1]
        hd = C // n_head

        q_slab = q_ref[0] * sm_scale      # fold 1/sqrt(hd) into q: tq*C VPU work
        k_slab = k_ref[0]
        v_slab = v_ref[0]

        row = qi * tq + jax.lax.broadcasted_iota(jnp.int32, (tq, tk), 0)
        col = ki * tk + jax.lax.broadcasted_iota(jnp.int32, (tq, tk), 1)
        causal = col <= row               # shared across heads

        for h in range(n_head):           # static unroll over heads
            qh = q_slab[:, h * hd:(h + 1) * hd]   # (tq, hd)
            kh = k_slab[:, h * hd:(h + 1) * hd]   # (tk, hd)
            vh = v_slab[:, h * hd:(h + 1) * hd]   # (tk, hd)

            # q . k^T via dot_general (contract over hd) -- no explicit k.T relayout.
            s = jax.lax.dot_general(qh, kh, (((1,), (1,)), ((), ())),
                                    preferred_element_type=jnp.float32)   # (tq, tk)
            s = jnp.where(causal, s, -1e30)       # finite fill -> no NaN risk

            m_prev = m_sc[h]
            m_new = jnp.maximum(m_prev, jnp.max(s, axis=-1, keepdims=True))
            alpha = jnp.exp(m_prev - m_new)
            p = jnp.exp(s - m_new)                # softmax math stays in f32 (v5e-safe)

            l_sc[h] = alpha * l_sc[h] + jnp.sum(p, axis=-1, keepdims=True)
            pv = jax.lax.dot_general(p.astype(vh.dtype), vh,
                                     (((1,), (0,)), ((), ())),
                                     preferred_element_type=jnp.float32)  # (tq, hd)
            acc_sc[h] = alpha * acc_sc[h] + pv
            m_sc[h] = m_new

    @pl.when(ki == pl.num_programs(2) - 1)
    def _finalize():
        C = o_ref.shape[2]
        hd = C // n_head
        for h in range(n_head):
            inv_l = pl.reciprocal(l_sc[h], approx=True)   # EUP slot, frees VALU
            o_ref[0, :, h * hd:(h + 1) * hd] = (acc_sc[h] * inv_l).astype(o_ref.dtype)


def causal_mha(q, k, v, n_head, *, block_q=128, block_k=128):
    """q, k, v: (B, T, C) with heads packed on the feature axis -> (B, T, C)."""
    B, T, C = q.shape
    assert C % n_head == 0
    hd = C // n_head
    sm_scale = 1.0 / math.sqrt(hd)

    t = min(min(block_q, block_k), _round_up(T, 8))   # square tiles -> block-level skip
    Tp = _round_up(T, t)
    if Tp != T:
        # Padded key rows have col >= T > any real row index, so the causal mask
        # excludes them automatically; padded query rows are sliced off below.
        pad = ((0, 0), (0, Tp - T), (0, 0))
        q, k, v = jnp.pad(q, pad), jnp.pad(k, pad), jnp.pad(v, pad)

    q_spec = pl.BlockSpec((1, t, C), lambda b, qi, ki: (b, qi, 0))
    # Clamp skipped (fully masked) kv blocks onto the diagonal block: same block
    # index as the previous step, so Pallas elides the redundant DMA.
    kv_spec = pl.BlockSpec((1, t, C), lambda b, qi, ki: (b, jnp.minimum(ki, qi), 0))
    o_spec = pl.BlockSpec((1, t, C), lambda b, qi, ki: (b, qi, 0))

    kernel = functools.partial(_flash_mha_kernel, n_head=n_head, sm_scale=sm_scale)
    out = pl.pallas_call(
        kernel,
        out_shape=jax.ShapeDtypeStruct((B, Tp, C), q.dtype),
        grid_spec=pltpu.PrefetchScalarGridSpec(
            num_scalar_prefetch=0,
            grid=(B, Tp // t, Tp // t),
            in_specs=[q_spec, kv_spec, kv_spec],
            out_specs=o_spec,
            scratch_shapes=[
                pltpu.VMEM((n_head, t, 1), jnp.float32),    # running max m
                pltpu.VMEM((n_head, t, 1), jnp.float32),    # running sum l
                pltpu.VMEM((n_head, t, hd), jnp.float32),   # output accumulator
            ],
        ),
        compiler_params=pltpu.CompilerParams(
            dimension_semantics=("parallel", "parallel", "arbitrary"),
            vmem_limit_bytes=32 * 1024 * 1024,
        ),
    )(q, k, v)
    return out[:, :T, :]


# ---------------------------------------------------------------------------
# Full forward pass (glue in plain JAX, hot paths in Pallas)
# ---------------------------------------------------------------------------
def attention_forward(x, params, n_head, *, compute_dtype=jnp.bfloat16,
                      block_q=128, block_k=128):
    B, T, C = x.shape
    # c_attn; emitted in compute dtype to halve the intermediate HBM traffic.
    qkv = linear(x.reshape(B * T, C), params["w_attn"], params["b_attn"],
                 compute_dtype=compute_dtype, out_dtype=compute_dtype)
    qkv = qkv.reshape(B, T, 3 * C)
    q, k, v = jnp.split(qkv, 3, axis=2)           # (B, T, C) each; no head transposes

    y = causal_mha(q, k, v, n_head, block_q=block_q, block_k=block_k)   # (B, T, C)

    out = linear(y.reshape(B * T, C), params["w_proj"], params["b_proj"],
                 compute_dtype=compute_dtype, out_dtype=jnp.float32)
    return out.reshape(B, T, C)


# ---------------------------------------------------------------------------
# Pure-JAX reference for verification
# ---------------------------------------------------------------------------
def attention_reference(x, params, n_head):
    B, T, C = x.shape
    hd = C // n_head
    qkv = x.reshape(B * T, C) @ params["w_attn"] + params["b_attn"]
    qkv = qkv.reshape(B, T, 3 * C)
    q, k, v = jnp.split(qkv, 3, axis=2)
    q = q.reshape(B, T, n_head, hd).transpose(0, 2, 1, 3)
    k = k.reshape(B, T, n_head, hd).transpose(0, 2, 1, 3)
    v = v.reshape(B, T, n_head, hd).transpose(0, 2, 1, 3)
    att = jnp.einsum("bhqd,bhkd->bhqk", q, k) / math.sqrt(hd)
    mask = jnp.tril(jnp.ones((T, T), dtype=bool))
    att = jnp.where(mask[None, None], att, -jnp.inf)
    att = jax.nn.softmax(att, axis=-1)
    y = jnp.einsum("bhqk,bhkd->bhqd", att, v)
    y = y.transpose(0, 2, 1, 3).reshape(B, T, C)
    out = y.reshape(B * T, C) @ params["w_proj"] + params["b_proj"]
    return out.reshape(B, T, C)


if __name__ == "__main__":
    # Small config consistent with the module: n_embd=32, n_head=4, block_size>=T
    B, T, C, n_head = 2, 8, 32, 4

    key = jax.random.PRNGKey(0)
    k_x, k_wa, k_ba, k_wp, k_bp = jax.random.split(key, 5)

    x = jax.random.normal(k_x, (B, T, C), dtype=jnp.float32)
    params = {
        # c_attn: nn.Linear(C, 3C) stored as (in, out)
        "w_attn": jax.random.normal(k_wa, (C, 3 * C), dtype=jnp.float32) * 0.02,
        "b_attn": jax.random.normal(k_ba, (3 * C,), dtype=jnp.float32) * 0.02,
        # c_proj: nn.Linear(C, C)
        "w_proj": jax.random.normal(k_wp, (C, C), dtype=jnp.float32) * 0.02,
        "b_proj": jax.random.normal(k_bp, (C,), dtype=jnp.float32) * 0.02,
    }

    ref = attention_reference(x, params, n_head)

    # f32 matmul operands: tight check of the kernel math (flash softmax, masking, bias).
    fwd_f32 = jax.jit(functools.partial(attention_forward, n_head=n_head,
                                        compute_dtype=jnp.float32))
    out_f32 = jax.block_until_ready(fwd_f32(x, params))
    assert out_f32.shape == (B, T, C)
    assert jnp.allclose(out_f32, ref, atol=2e-3, rtol=2e-3), "f32 mismatch vs reference"

    # bf16 matmul operands (default perf configuration), f32 accumulation: looser tol.
    fwd_bf16 = jax.jit(functools.partial(attention_forward, n_head=n_head,
                                         compute_dtype=jnp.bfloat16))
    out_bf16 = jax.block_until_ready(fwd_bf16(x, params))
    assert out_bf16.shape == (B, T, C)
    assert jnp.allclose(out_bf16, ref, atol=2e-2, rtol=2e-2), "bf16 mismatch vs reference"

    print("KERNEL_OK")
</pallas_src>

<mosaic_0001>
module attributes {stable_mosaic.version = 11 : i64} {
  func.func @_linear_kernel(%arg0: i32, %arg1: i32, %arg2: i32, %arg3: memref<16x128xf32, #tpu.memory_space<vmem>>, %arg4: memref<128x128xf32, #tpu.memory_space<vmem>>, %arg5: memref<1x128xf32, #tpu.memory_space<vmem>>, %arg6: memref<16x128xf32, #tpu.memory_space<vmem>>, %arg7: memref<16x128xf32, #tpu.memory_space<vmem>>) attributes {dimension_semantics = [#tpu.dimension_semantics<parallel>, #tpu.dimension_semantics<parallel>, #tpu.dimension_semantics<arbitrary>], iteration_bounds = array<i64: 1, 1, 1>, scalar_prefetch = 0 : i64, scratch_operands = 1 : i64, tpu.core_type = #tpu.core_type<tc>, window_params = [{transform_indices = @transform_0, window_bounds = array<i64: 16, 128>}, {transform_indices = @transform_1, window_bounds = array<i64: 128, 128>}, {transform_indices = @transform_2, window_bounds = array<i64: 1, 128>}, {transform_indices = @transform_3, window_bounds = array<i64: 16, 128>}]} {
    %c0_i32 = arith.constant 0 : i32
    %0 = arith.cmpi eq, %arg2, %c0_i32 : i32
    %1 = arith.extui %0 : i1 to i32
    %c0_i32_0 = arith.constant 0 : i32
    %2 = arith.cmpi ne, %1, %c0_i32_0 : i32
    scf.if %2 {
      %cst_10 = arith.constant 0.000000e+00 : f32
      %12 = vector.broadcast %cst_10 : f32 to vector<16x128xf32>
      %c0_11 = arith.constant 0 : index
      %c0_12 = arith.constant 0 : index
      %13 = vector.load %arg7[%c0_11, %c0_12] : memref<16x128xf32, #tpu.memory_space<vmem>>, vector<16x128xf32>
      tpu.vector_store %arg7[%c0_11, %c0_12], %12 {strides = array<i32>} : memref<16x128xf32, #tpu.memory_space<vmem>>, vector<16x128xf32>,
    } else {
    }
    %c0 = arith.constant 0 : index
    %c0_1 = arith.constant 0 : index
    %3 = vector.load %arg7[%c0, %c0_1] : memref<16x128xf32, #tpu.memory_space<vmem>>, vector<16x128xf32>
    %c0_2 = arith.constant 0 : index
    %c0_3 = arith.constant 0 : index
    %4 = vector.load %arg3[%c0_2, %c0_3] : memref<16x128xf32, #tpu.memory_space<vmem>>, vector<16x128xf32>
    %c0_4 = arith.constant 0 : index
    %c0_5 = arith.constant 0 : index
    %5 = vector.load %arg4[%c0_4, %c0_5] : memref<128x128xf32, #tpu.memory_space<vmem>>, vector<128x128xf32>
    %cst = arith.constant dense<0.000000e+00> : vector<16x128xf32>
    %6 = tpu.matmul %4, %5, %cst {dimension_numbers = #tpu.dot_dimension_numbers<[1], [0], [0], [1], [0, 0, 1, 1], [], []>} : vector<16x128xf32>, vector<128x128xf32>, vector<16x128xf32> -> vector<16x128xf32>
    %7 = arith.addf %3, %6 : vector<16x128xf32>
    %c0_6 = arith.constant 0 : index
    %c0_7 = arith.constant 0 : index
    %8 = vector.load %arg7[%c0_6, %c0_7] : memref<16x128xf32, #tpu.memory_space<vmem>>, vector<16x128xf32>
    tpu.vector_store %arg7[%c0_6, %c0_7], %7 {strides = array<i32>} : memref<16x128xf32, #tpu.memory_space<vmem>>, vector<16x128xf32>,
    %c0_i32_8 = arith.constant 0 : i32
    %9 = arith.cmpi eq, %arg2, %c0_i32_8 : i32
    %10 = arith.extui %9 : i1 to i32
    %c0_i32_9 = arith.constant 0 : i32
    %11 = arith.cmpi ne, %10, %c0_i32_9 : i32
    scf.if %11 {
      %c0_10 = arith.constant 0 : index
      %c0_11 = arith.constant 0 : index
      %12 = vector.load %arg7[%c0_10, %c0_11] : memref<16x128xf32, #tpu.memory_space<vmem>>, vector<16x128xf32>
      %c0_12 = arith.constant 0 : index
      %c0_13 = arith.constant 0 : index
      %13 = vector.load %arg5[%c0_12, %c0_13] : memref<1x128xf32, #tpu.memory_space<vmem>>, vector<1x128xf32>
      %14 = vector.broadcast %13 : vector<1x128xf32> to vector<16x128xf32>
      %15 = arith.addf %12, %14 : vector<16x128xf32>
      %c0_14 = arith.constant 0 : index
      %c0_15 = arith.constant 0 : index
      %16 = vector.load %arg6[%c0_14, %c0_15] : memref<16x128xf32, #tpu.memory_space<vmem>>, vector<16x128xf32>
      tpu.vector_store %arg6[%c0_14, %c0_15], %15 {strides = array<i32>} : memref<16x128xf32, #tpu.memory_space<vmem>>, vector<16x128xf32>,
    } else {
    }
    return
  }
  func.func @transform_0(%arg0: i32, %arg1: i32, %arg2: i32) -> (i32, i32) {
    %c0_i32 = arith.constant 0 : i32
    return %arg0, %arg2 : i32, i32
  }
  func.func @transform_1(%arg0: i32, %arg1: i32, %arg2: i32) -> (i32, i32) {
    %c0_i32 = arith.constant 0 : i32
    return %arg2, %arg1 : i32, i32
  }
  func.func @transform_2(%arg0: i32, %arg1: i32, %arg2: i32) -> (i32, i32) {
    %c0_i32 = arith.constant 0 : i32
    %c0_i32_0 = arith.constant 0 : i32
    return %c0_i32, %arg1 : i32, i32
  }
  func.func @transform_3(%arg0: i32, %arg1: i32, %arg2: i32) -> (i32, i32) {
    %c0_i32 = arith.constant 0 : i32
    return %arg0, %arg1 : i32, i32
  }
}

module attributes {stable_mosaic.version = 11 : i64} {
  func.func @_flash_mha_kernel(%arg0: i32, %arg1: i32, %arg2: i32, %arg3: memref<1x8x32xf32, #tpu.memory_space<vmem>>, %arg4: memref<1x8x32xf32, #tpu.memory_space<vmem>>, %arg5: memref<1x8x32xf32, #tpu.memory_space<vmem>>, %arg6: memref<1x8x32xf32, #tpu.memory_space<vmem>>, %arg7: memref<4x8x1xf32, #tpu.memory_space<vmem>>, %arg8: memref<4x8x1xf32, #tpu.memory_space<vmem>>, %arg9: memref<4x8x8xf32, #tpu.memory_space<vmem>>) attributes {dimension_semantics = [#tpu.dimension_semantics<parallel>, #tpu.dimension_semantics<parallel>, #tpu.dimension_semantics<arbitrary>], iteration_bounds = array<i64: 2, 1, 1>, scalar_prefetch = 0 : i64, scratch_operands = 3 : i64, tpu.core_type = #tpu.core_type<tc>, window_params = [{transform_indices = @transform_0, window_bounds = array<i64: 1, 8, 32>}, {transform_indices = @transform_1, window_bounds = array<i64: 1, 8, 32>}, {transform_indices = @transform_2, window_bounds = array<i64: 1, 8, 32>}, {transform_indices = @transform_3, window_bounds = array<i64: 1, 8, 32>}]} {
    %c0_i32 = arith.constant 0 : i32
    %0 = arith.cmpi eq, %arg2, %c0_i32 : i32
    %1 = arith.extui %0 : i1 to i32
    %c0_i32_0 = arith.constant 0 : i32
    %2 = arith.cmpi ne, %1, %c0_i32_0 : i32
    scf.if %2 {
      %cst = arith.constant 0xFF800000 : f32
      %9 = vector.broadcast %cst : f32 to vector<4x8x1xf32>
      %c0 = arith.constant 0 : index
      %c0_4 = arith.constant 0 : index
      %c0_5 = arith.constant 0 : index
      %10 = vector.load %arg7[%c0, %c0_4, %c0_5] : memref<4x8x1xf32, #tpu.memory_space<vmem>>, vector<4x8x1xf32>
      tpu.vector_store %arg7[%c0, %c0_4, %c0_5], %9 {strides = array<i32>} : memref<4x8x1xf32, #tpu.memory_space<vmem>>, vector<4x8x1xf32>,
      %cst_6 = arith.constant 0.000000e+00 : f32
      %11 = vector.broadcast %cst_6 : f32 to vector<4x8x1xf32>
      %c0_7 = arith.constant 0 : index
      %c0_8 = arith.constant 0 : index
      %c0_9 = arith.constant 0 : index
      %12 = vector.load %arg8[%c0_7, %c0_8, %c0_9] : memref<4x8x1xf32, #tpu.memory_space<vmem>>, vector<4x8x1xf32>
      tpu.vector_store %arg8[%c0_7, %c0_8, %c0_9], %11 {strides = array<i32>} : memref<4x8x1xf32, #tpu.memory_space<vmem>>, vector<4x8x1xf32>,
      %cst_10 = arith.constant 0.000000e+00 : f32
      %13 = vector.broadcast %cst_10 : f32 to vector<4x8x8xf32>
      %c0_11 = arith.constant 0 : index
      %c0_12 = arith.constant 0 : index
      %c0_13 = arith.constant 0 : index
      %14 = vector.load %arg9[%c0_11, %c0_12, %c0_13] : memref<4x8x8xf32, #tpu.memory_space<vmem>>, vector<4x8x8xf32>
      tpu.vector_store %arg9[%c0_11, %c0_12, %c0_13], %13 {strides = array<i32>} : memref<4x8x8xf32, #tpu.memory_space<vmem>>, vector<4x8x8xf32>,
    } else {
    }
    %3 = arith.cmpi sle, %arg2, %arg1 : i32
    %4 = arith.extui %3 : i1 to i32
    %c0_i32_1 = arith.constant 0 : i32
    %5 = arith.cmpi ne, %4, %c0_i32_1 : i32
    scf.if %5 {
      %c0 = arith.constant 0 : index
      %c0_4 = arith.constant 0 : index
      %c0_5 = arith.constant 0 : index
      %9 = vector.load %arg3[%c0, %c0_4, %c0_5] : memref<1x8x32xf32, #tpu.memory_space<vmem>>, vector<1x8x32xf32>
      %10 = vector.shape_cast %9 : vector<1x8x32xf32> to vector<8x32xf32>
      %cst = arith.constant 0.353553385 : f32
      %11 = vector.broadcast %cst : f32 to vector<8x32xf32>
      %12 = arith.mulf %10, %11 : vector<8x32xf32>
      %c0_6 = arith.constant 0 : index
      %c0_7 = arith.constant 0 : index
      %c0_8 = arith.constant 0 : index
      %13 = vector.load %arg4[%c0_6, %c0_7, %c0_8] : memref<1x8x32xf32, #tpu.memory_space<vmem>>, vector<1x8x32xf32>
      %14 = vector.shape_cast %13 : vector<1x8x32xf32> to vector<8x32xf32>
      %c0_9 = arith.constant 0 : index
      %c0_10 = arith.constant 0 : index
      %c0_11 = arith.constant 0 : index
      %15 = vector.load %arg5[%c0_9, %c0_10, %c0_11] : memref<1x8x32xf32, #tpu.memory_space<vmem>>, vector<1x8x32xf32>
      %16 = vector.shape_cast %15 : vector<1x8x32xf32> to vector<8x32xf32>
      %c8_i32 = arith.constant 8 : i32
      %17 = arith.muli %arg1, %c8_i32 : i32
      %18 = tpu.iota {dimensions = array<i32: 0>} : vector<8x8xi32>
      %19 = vector.broadcast %17 : i32 to vector<8x8xi32>
      %20 = arith.addi %19, %18 : vector<8x8xi32>
      %c8_i32_12 = arith.constant 8 : i32
      %21 = arith.muli %arg2, %c8_i32_12 : i32
      %22 = tpu.iota {dimensions = array<i32: 1>} : vector<8x8xi32>
      %23 = vector.broadcast %21 : i32 to vector<8x8xi32>
      %24 = arith.addi %23, %22 : vector<8x8xi32>
      %25 = arith.cmpi sle, %24, %20 : vector<8x8xi32>
      %26 = vector.extract_strided_slice %12 {offsets = [0, 0], sizes = [8, 8], strides = [1, 1]} : vector<8x32xf32> to vector<8x8xf32>
      %27 = vector.extract_strided_slice %14 {offsets = [0, 0], sizes = [8, 8], strides = [1, 1]} : vector<8x32xf32> to vector<8x8xf32>
      %28 = vector.extract_strided_slice %16 {offsets = [0, 0], sizes = [8, 8], strides = [1, 1]} : vector<8x32xf32> to vector<8x8xf32>
      %cst_13 = arith.constant dense<0.000000e+00> : vector<8x8xf32>
      %29 = tpu.matmul %26, %27, %cst_13 {dimension_numbers = #tpu.dot_dimension_numbers<[1], [1], [0], [0], [0, 0, 1, 0], [], []>} : vector<8x8xf32>, vector<8x8xf32>, vector<8x8xf32> -> vector<8x8xf32>
      %cst_14 = arith.constant -1.000000e+30 : f32
      %30 = vector.broadcast %cst_14 : f32 to vector<8x8xf32>
      %31 = arith.select %25, %29, %30 : vector<8x8xi1>, vector<8x8xf32>
      %c0_15 = arith.constant 0 : index
      %c0_16 = arith.constant 0 : index
      %c0_17 = arith.constant 0 : index
      %32 = vector.load %arg7[%c0_15, %c0_16, %c0_17] : memref<4x8x1xf32, #tpu.memory_space<vmem>>, vector<1x8x1xf32>
      %33 = vector.shape_cast %32 : vector<1x8x1xf32> to vector<8x1xf32>
      %cst_18 = arith.constant dense<0xFF800000> : vector<8xf32>
      %34 = vector.multi_reduction <maximumf>, %31, %cst_18 [1] : vector<8x8xf32> to vector<8xf32>
      %35 = vector.shape_cast %34 : vector<8xf32> to vector<8x1xf32>
      %36 = arith.maximumf %33, %35 : vector<8x1xf32>
      %37 = arith.subf %33, %36 : vector<8x1xf32>
      %38 = math.exp %37 : vector<8x1xf32>
      %39 = vector.broadcast %36 : vector<8x1xf32> to vector<8x8xf32>
      %40 = arith.subf %31, %39 : vector<8x8xf32>
      %41 = math.exp %40 : vector<8x8xf32>
      %c0_19 = arith.constant 0 : index
      %c0_20 = arith.constant 0 : index
      %c0_21 = arith.constant 0 : index
      %42 = vector.load %arg8[%c0_19, %c0_20, %c0_21] : memref<4x8x1xf32, #tpu.memory_space<vmem>>, vector<1x8x1xf32>
      %43 = vector.shape_cast %42 : vector<1x8x1xf32> to vector<8x1xf32>
      %44 = arith.mulf %38, %43 : vector<8x1xf32>
      %cst_22 = arith.constant dense<0.000000e+00> : vector<8xf32>
      %45 = vector.multi_reduction <add>, %41, %cst_22 [1] : vector<8x8xf32> to vector<8xf32>
      %46 = vector.shape_cast %45 : vector<8xf32> to vector<8x1xf32>
      %47 = arith.addf %44, %46 : vector<8x1xf32>
      %c0_23 = arith.constant 0 : index
      %c0_24 = arith.constant 0 : index
      %c0_25 = arith.constant 0 : index
      %48 = vector.load %arg8[%c0_23, %c0_24, %c0_25] : memref<4x8x1xf32, #tpu.memory_space<vmem>>, vector<1x8x1xf32>
      %49 = vector.shape_cast %48 : vector<1x8x1xf32> to vector<8x1xf32>
      %50 = vector.shape_cast %47 : vector<8x1xf32> to vector<1x8x1xf32>
      tpu.vector_store %arg8[%c0_23, %c0_24, %c0_25], %50 {strides = array<i32>} : memref<4x8x1xf32, #tpu.memory_space<vmem>>, vector<1x8x1xf32>,
      %cst_26 = arith.constant dense<0.000000e+00> : vector<8x8xf32>
      %51 = tpu.matmul %41, %28, %cst_26 {dimension_numbers = #tpu.dot_dimension_numbers<[1], [0], [0], [1], [0, 0, 1, 1], [], []>} : vector<8x8xf32>, vector<8x8xf32>, vector<8x8xf32> -> vector<8x8xf32>
      %c0_27 = arith.constant 0 : index
      %c0_28 = arith.constant 0 : index
      %c0_29 = arith.constant 0 : index
      %52 = vector.load %arg9[%c0_27, %c0_28, %c0_29] : memref<4x8x8xf32, #tpu.memory_space<vmem>>, vector<1x8x8xf32>
      %53 = vector.shape_cast %52 : vector<1x8x8xf32> to vector<8x8xf32>
      %54 = vector.broadcast %38 : vector<8x1xf32> to vector<8x8xf32>
      %55 = arith.mulf %54, %53 : vector<8x8xf32>
      %56 = arith.addf %55, %51 : vector<8x8xf32>
      %c0_30 = arith.constant 0 : index
      %c0_31 = arith.constant 0 : index
      %c0_32 = arith.constant 0 : index
      %57 = vector.load %arg9[%c0_30, %c0_31, %c0_32] : memref<4x8x8xf32, #tpu.memory_space<vmem>>, vector<1x8x8xf32>
      %58 = vector.shape_cast %57 : vector<1x8x8xf32> to vector<8x8xf32>
      %59 = vector.shape_cast %56 : vector<8x8xf32> to vector<1x8x8xf32>
      tpu.vector_store %arg9[%c0_30, %c0_31, %c0_32], %59 {strides = array<i32>} : memref<4x8x8xf32, #tpu.memory_space<vmem>>, vector<1x8x8xf32>,
      %c0_33 = arith.constant 0 : index
      %c0_34 = arith.constant 0 : index
      %c0_35 = arith.constant 0 : index
      %60 = vector.load %arg7[%c0_33, %c0_34, %c0_35] : memref<4x8x1xf32, #tpu.memory_space<vmem>>, vector<1x8x1xf32>
      %61 = vector.shape_cast %60 : vector<1x8x1xf32> to vector<8x1xf32>
      %62 = vector.shape_cast %36 : vector<8x1xf32> to vector<1x8x1xf32>
      tpu.vector_store %arg7[%c0_33, %c0_34, %c0_35], %62 {strides = array<i32>} : memref<4x8x1xf32, #tpu.memory_space<vmem>>, vector<1x8x1xf32>,
      %63 = vector.extract_strided_slice %12 {offsets = [0, 8], sizes = [8, 8], strides = [1, 1]} : vector<8x32xf32> to vector<8x8xf32>
      %64 = vector.extract_strided_slice %14 {offsets = [0, 8], sizes = [8, 8], strides = [1, 1]} : vector<8x32xf32> to vector<8x8xf32>
      %65 = vector.extract_strided_slice %16 {offsets = [0, 8], sizes = [8, 8], strides = [1, 1]} : vector<8x32xf32> to vector<8x8xf32>
      %cst_36 = arith.constant dense<0.000000e+00> : vector<8x8xf32>
      %66 = tpu.matmul %63, %64, %cst_36 {dimension_numbers = #tpu.dot_dimension_numbers<[1], [1], [0], [0], [0, 0, 1, 0], [], []>} : vector<8x8xf32>, vector<8x8xf32>, vector<8x8xf32> -> vector<8x8xf32>
      %cst_37 = arith.constant -1.000000e+30 : f32
      %67 = vector.broadcast %cst_37 : f32 to vector<8x8xf32>
      %68 = arith.select %25, %66, %67 : vector<8x8xi1>, vector<8x8xf32>
      %c1 = arith.constant 1 : index
      %c0_38 = arith.constant 0 : index
      %c0_39 = arith.constant 0 : index
      %69 = vector.load %arg7[%c1, %c0_38, %c0_39] : memref<4x8x1xf32, #tpu.memory_space<vmem>>, vector<1x8x1xf32>
      %70 = vector.shape_cast %69 : vector<1x8x1xf32> to vector<8x1xf32>
      %cst_40 = arith.constant dense<0xFF800000> : vector<8xf32>
      %71 = vector.multi_reduction <maximumf>, %68, %cst_40 [1] : vector<8x8xf32> to vector<8xf32>
      %72 = vector.shape_cast %71 : vector<8xf32> to vector<8x1xf32>
      %73 = arith.maximumf %70, %72 : vector<8x1xf32>
      %74 = arith.subf %70, %73 : vector<8x1xf32>
      %75 = math.exp %74 : vector<8x1xf32>
      %76 = vector.broadcast %73 : vector<8x1xf32> to vector<8x8xf32>
      %77 = arith.subf %68, %76 : vector<8x8xf32>
      %78 = math.exp %77 : vector<8x8xf32>
      %c1_41 = arith.constant 1 : index
      %c0_42 = arith.constant 0 : index
      %c0_43 = arith.constant 0 : index
      %79 = vector.load %arg8[%c1_41, %c0_42, %c0_43] : memref<4x8x1xf32, #tpu.memory_space<vmem>>, vector<1x8x1xf32>
      %80 = vector.shape_cast %79 : vector<1x8x1xf32> to vector<8x1xf32>
      %81 = arith.mulf %75, %80 : vector<8x1xf32>
      %cst_44 = arith.constant dense<0.000000e+00> : vector<8xf32>
      %82 = vector.multi_reduction <add>, %78, %cst_44 [1] : vector<8x8xf32> to vector<8xf32>
      %83 = vector.shape_cast %82 : vector<8xf32> to vector<8x1xf32>
      %84 = arith.addf %81, %83 : vector<8x1xf32>
      %c1_45 = arith.constant 1 : index
      %c0_46 = arith.constant 0 : index
      %c0_47 = arith.constant 0 : index
      %85 = vector.load %arg8[%c1_45, %c0_46, %c0_47] : memref<4x8x1xf32, #tpu.memory_space<vmem>>, vector<1x8x1xf32>
      %86 = vector.shape_cast %85 : vector<1x8x1xf32> to vector<8x1xf32>
      %87 = vector.shape_cast %84 : vector<8x1xf32> to vector<1x8x1xf32>
      tpu.vector_store %arg8[%c1_45, %c0_46, %c0_47], %87 {strides = array<i32>} : memref<4x8x1xf32, #tpu.memory_space<vmem>>, vector<1x8x1xf32>,
      %cst_48 = arith.constant dense<0.000000e+00> : vector<8x8xf32>
      %88 = tpu.matmul %78, %65, %cst_48 {dimension_numbers = #tpu.dot_dimension_numbers<[1], [0], [0], [1], [0, 0, 1, 1], [], []>} : vector<8x8xf32>, vector<8x8xf32>, vector<8x8xf32> -> vector<8x8xf32>
      %c1_49 = arith.constant 1 : index
      %c0_50 = arith.constant 0 : index
      %c0_51 = arith.constant 0 : index
      %89 = vector.load %arg9[%c1_49, %c0_50, %c0_51] : memref<4x8x8xf32, #tpu.memory_space<vmem>>, vector<1x8x8xf32>
      %90 = vector.shape_cast %89 : vector<1x8x8xf32> to vector<8x8xf32>
      %91 = vector.broadcast %75 : vector<8x1xf32> to vector<8x8xf32>
      %92 = arith.mulf %91, %90 : vector<8x8xf32>
      %93 = arith.addf %92, %88 : vector<8x8xf32>
      %c1_52 = arith.constant 1 : index
      %c0_53 = arith.constant 0 : index
      %c0_54 = arith.constant 0 : index
      %94 = vector.load %arg9[%c1_52, %c0_53, %c0_54] : memref<4x8x8xf32, #tpu.memory_space<vmem>>, vector<1x8x8xf32>
      %95 = vector.shape_cast %94 : vector<1x8x8xf32> to vector<8x8xf32>
      %96 = vector.shape_cast %93 : vector<8x8xf32> to vector<1x8x8xf32>
      tpu.vector_store %arg9[%c1_52, %c0_53, %c0_54], %96 {strides = array<i32>} : memref<4x8x8xf32, #tpu.memory_space<vmem>>, vector<1x8x8xf32>,
      %c1_55 = arith.constant 1 : index
      %c0_56 = arith.constant 0 : index
      %c0_57 = arith.constant 0 : index
      %97 = vector.load %arg7[%c1_55, %c0_56, %c0_57] : memref<4x8x1xf32, #tpu.memory_space<vmem>>, vector<1x8x1xf32>
      %98 = vector.shape_cast %97 : vector<1x8x1xf32> to vector<8x1xf32>
      %99 = vector.shape_cast %73 : vector<8x1xf32> to vector<1x8x1xf32>
      tpu.vector_store %arg7[%c1_55, %c0_56, %c0_57], %99 {strides = array<i32>} : memref<4x8x1xf32, #tpu.memory_space<vmem>>, vector<1x8x1xf32>,
      %100 = vector.extract_strided_slice %12 {offsets = [0, 16], sizes = [8, 8], strides = [1, 1]} : vector<8x32xf32> to vector<8x8xf32>
      %101 = vector.extract_strided_slice %14 {offsets = [0, 16], sizes = [8, 8], strides = [1, 1]} : vector<8x32xf32> to vector<8x8xf32>
      %102 = vector.extract_strided_slice %16 {offsets = [0, 16], sizes = [8, 8], strides = [1, 1]} : vector<8x32xf32> to vector<8x8xf32>
      %cst_58 = arith.constant dense<0.000000e+00> : vector<8x8xf32>
      %103 = tpu.matmul %100, %101, %cst_58 {dimension_numbers = #tpu.dot_dimension_numbers<[1], [1], [0], [0], [0, 0, 1, 0], [], []>} : vector<8x8xf32>, vector<8x8xf32>, vector<8x8xf32> -> vector<8x8xf32>
      %cst_59 = arith.constant -1.000000e+30 : f32
      %104 = vector.broadcast %cst_59 : f32 to vector<8x8xf32>
      %105 = arith.select %25, %103, %104 : vector<8x8xi1>, vector<8x8xf32>
      %c2 = arith.constant 2 : index
      %c0_60 = arith.constant 0 : index
      %c0_61 = arith.constant 0 : index
      %106 = vector.load %arg7[%c2, %c0_60, %c0_61] : memref<4x8x1xf32, #tpu.memory_space<vmem>>, vector<1x8x1xf32>
      %107 = vector.shape_cast %106 : vector<1x8x1xf32> to vector<8x1xf32>
      %cst_62 = arith.constant dense<0xFF800000> : vector<8xf32>
      %108 = vector.multi_reduction <maximumf>, %105, %cst_62 [1] : vector<8x8xf32> to vector<8xf32>
      %109 = vector.shape_cast %108 : vector<8xf32> to vector<8x1xf32>
      %110 = arith.maximumf %107, %109 : vector<8x1xf32>
      %111 = arith.subf %107, %110 : vector<8x1xf32>
      %112 = math.exp %111 : vector<8x1xf32>
      %113 = vector.broadcast %110 : vector<8x1xf32> to vector<8x8xf32>
      %114 = arith.subf %105, %113 : vector<8x8xf32>
      %115 = math.exp %114 : vector<8x8xf32>
      %c2_63 = arith.constant 2 : index
      %c0_64 = arith.constant 0 : index
      %c0_65 = arith.constant 0 : index
      %116 = vector.load %arg8[%c2_63, %c0_64, %c0_65] : memref<4x8x1xf32, #tpu.memory_space<vmem>>, vector<1x8x1xf32>
      %117 = vector.shape_cast %116 : vector<1x8x1xf32> to vector<8x1xf32>
      %118 = arith.mulf %112, %117 : vector<8x1xf32>
      %cst_66 = arith.constant dense<0.000000e+00> : vector<8xf32>
      %119 = vector.multi_reduction <add>, %115, %cst_66 [1] : vector<8x8xf32> to vector<8xf32>
      %120 = vector.shape_cast %119 : vector<8xf32> to vector<8x1xf32>
      %121 = arith.addf %118, %120 : vector<8x1xf32>
      %c2_67 = arith.constant 2 : index
      %c0_68 = arith.constant 0 : index
      %c0_69 = arith.constant 0 : index
      %122 = vector.load %arg8[%c2_67, %c0_68, %c0_69] : memref<4x8x1xf32, #tpu.memory_space<vmem>>, vector<1x8x1xf32>
      %123 = vector.shape_cast %122 : vector<1x8x1xf32> to vector<8x1xf32>
      %124 = vector.shape_cast %121 : vector<8x1xf32> to vector<1x8x1xf32>
      tpu.vector_store %arg8[%c2_67, %c0_68, %c0_69], %124 {strides = array<i32>} : memref<4x8x1xf32, #tpu.memory_space<vmem>>, vector<1x8x1xf32>,
      %cst_70 = arith.constant dense<0.000000e+00> : vector<8x8xf32>
      %125 = tpu.matmul %115, %102, %cst_70 {dimension_numbers = #tpu.dot_dimension_numbers<[1], [0], [0], [1], [0, 0, 1, 1], [], []>} : vector<8x8xf32>, vector<8x8xf32>, vector<8x8xf32> -> vector<8x8xf32>
      %c2_71 = arith.constant 2 : index
      %c0_72 = arith.constant 0 : index
      %c0_73 = arith.constant 0 : index
      %126 = vector.load %arg9[%c2_71, %c0_72, %c0_73] : memref<4x8x8xf32, #tpu.memory_space<vmem>>, vector<1x8x8xf32>
      %127 = vector.shape_cast %126 : vector<1x8x8xf32> to vector<8x8xf32>
      %128 = vector.broadcast %112 : vector<8x1xf32> to vector<8x8xf32>
      %129 = arith.mulf %128, %127 : vector<8x8xf32>
      %130 = arith.addf %129, %125 : vector<8x8xf32>
      %c2_74 = arith.constant 2 : index
      %c0_75 = arith.constant 0 : index
      %c0_76 = arith.constant 0 : index
      %131 = vector.load %arg9[%c2_74, %c0_75, %c0_76] : memref<4x8x8xf32, #tpu.memory_space<vmem>>, vector<1x8x8xf32>
      %132 = vector.shape_cast %131 : vector<1x8x8xf32> to vector<8x8xf32>
      %133 = vector.shape_cast %130 : vector<8x8xf32> to vector<1x8x8xf32>
      tpu.vector_store %arg9[%c2_74, %c0_75, %c0_76], %133 {strides = array<i32>} : memref<4x8x8xf32, #tpu.memory_space<vmem>>, vector<1x8x8xf32>,
      %c2_77 = arith.constant 2 : index
      %c0_78 = arith.constant 0 : index
      %c0_79 = arith.constant 0 : index
      %134 = vector.load %arg7[%c2_77, %c0_78, %c0_79] : memref<4x8x1xf32, #tpu.memory_space<vmem>>, vector<1x8x1xf32>
      %135 = vector.shape_cast %134 : vector<1x8x1xf32> to vector<8x1xf32>
      %136 = vector.shape_cast %110 : vector<8x1xf32> to vector<1x8x1xf32>
      tpu.vector_store %arg7[%c2_77, %c0_78, %c0_79], %136 {strides = array<i32>} : memref<4x8x1xf32, #tpu.memory_space<vmem>>, vector<1x8x1xf32>,
      %137 = vector.extract_strided_slice %12 {offsets = [0, 24], sizes = [8, 8], strides = [1, 1]} : vector<8x32xf32> to vector<8x8xf32>
      %138 = vector.extract_strided_slice %14 {offsets = [0, 24], sizes = [8, 8], strides = [1, 1]} : vector<8x32xf32> to vector<8x8xf32>
      %139 = vector.extract_strided_slice %16 {offsets = [0, 24], sizes = [8, 8], strides = [1, 1]} : vector<8x32xf32> to vector<8x8xf32>
      %cst_80 = arith.constant dense<0.000000e+00> : vector<8x8xf32>
      %140 = tpu.matmul %137, %138, %cst_80 {dimension_numbers = #tpu.dot_dimension_numbers<[1], [1], [0], [0], [0, 0, 1, 0], [], []>} : vector<8x8xf32>, vector<8x8xf32>, vector<8x8xf32> -> vector<8x8xf32>
      %cst_81 = arith.constant -1.000000e+30 : f32
      %141 = vector.broadcast %cst_81 : f32 to vector<8x8xf32>
      %142 = arith.select %25, %140, %141 : vector<8x8xi1>, vector<8x8xf32>
      %c3 = arith.constant 3 : index
      %c0_82 = arith.constant 0 : index
      %c0_83 = arith.constant 0 : index
      %143 = vector.load %arg7[%c3, %c0_82, %c0_83] : memref<4x8x1xf32, #tpu.memory_space<vmem>>, vector<1x8x1xf32>
      %144 = vector.shape_cast %143 : vector<1x8x1xf32> to vector<8x1xf32>
      %cst_84 = arith.constant dense<0xFF800000> : vector<8xf32>
      %145 = vector.multi_reduction <maximumf>, %142, %cst_84 [1] : vector<8x8xf32> to vector<8xf32>
      %146 = vector.shape_cast %145 : vector<8xf32> to vector<8x1xf32>
      %147 = arith.maximumf %144, %146 : vector<8x1xf32>
      %148 = arith.subf %144, %147 : vector<8x1xf32>
      %149 = math.exp %148 : vector<8x1xf32>
      %150 = vector.broadcast %147 : vector<8x1xf32> to vector<8x8xf32>
      %151 = arith.subf %142, %150 : vector<8x8xf32>
      %152 = math.exp %151 : vector<8x8xf32>
      %c3_85 = arith.constant 3 : index
      %c0_86 = arith.constant 0 : index
      %c0_87 = arith.constant 0 : index
      %153 = vector.load %arg8[%c3_85, %c0_86, %c0_87] : memref<4x8x1xf32, #tpu.memory_space<vmem>>, vector<1x8x1xf32>
      %154 = vector.shape_cast %153 : vector<1x8x1xf32> to vector<8x1xf32>
      %155 = arith.mulf %149, %154 : vector<8x1xf32>
      %cst_88 = arith.constant dense<0.000000e+00> : vector<8xf32>
      %156 = vector.multi_reduction <add>, %152, %cst_88 [1] : vector<8x8xf32> to vector<8xf32>
      %157 = vector.shape_cast %156 : vector<8xf32> to vector<8x1xf32>
      %158 = arith.addf %155, %157 : vector<8x1xf32>
      %c3_89 = arith.constant 3 : index
      %c0_90 = arith.constant 0 : index
      %c0_91 = arith.constant 0 : index
      %159 = vector.load %arg8[%c3_89, %c0_90, %c0_91] : memref<4x8x1xf32, #tpu.memory_space<vmem>>, vector<1x8x1xf32>
      %160 = vector.shape_cast %159 : vector<1x8x1xf32> to vector<8x1xf32>
      %161 = vector.shape_cast %158 : vector<8x1xf32> to vector<1x8x1xf32>
      tpu.vector_store %arg8[%c3_89, %c0_90, %c0_91], %161 {strides = array<i32>} : memref<4x8x1xf32, #tpu.memory_space<vmem>>, vector<1x8x1xf32>,
      %cst_92 = arith.constant dense<0.000000e+00> : vector<8x8xf32>
      %162 = tpu.matmul %152, %139, %cst_92 {dimension_numbers = #tpu.dot_dimension_numbers<[1], [0], [0], [1], [0, 0, 1, 1], [], []>} : vector<8x8xf32>, vector<8x8xf32>, vector<8x8xf32> -> vector<8x8xf32>
      %c3_93 = arith.constant 3 : index
      %c0_94 = arith.constant 0 : index
      %c0_95 = arith.constant 0 : index
      %163 = vector.load %arg9[%c3_93, %c0_94, %c0_95] : memref<4x8x8xf32, #tpu.memory_space<vmem>>, vector<1x8x8xf32>
      %164 = vector.shape_cast %163 : vector<1x8x8xf32> to vector<8x8xf32>
      %165 = vector.broadcast %149 : vector<8x1xf32> to vector<8x8xf32>
      %166 = arith.mulf %165, %164 : vector<8x8xf32>
      %167 = arith.addf %166, %162 : vector<8x8xf32>
      %c3_96 = arith.constant 3 : index
      %c0_97 = arith.constant 0 : index
      %c0_98 = arith.constant 0 : index
      %168 = vector.load %arg9[%c3_96, %c0_97, %c0_98] : memref<4x8x8xf32, #tpu.memory_space<vmem>>, vector<1x8x8xf32>
      %169 = vector.shape_cast %168 : vector<1x8x8xf32> to vector<8x8xf32>
      %170 = vector.shape_cast %167 : vector<8x8xf32> to vector<1x8x8xf32>
      tpu.vector_store %arg9[%c3_96, %c0_97, %c0_98], %170 {strides = array<i32>} : memref<4x8x8xf32, #tpu.memory_space<vmem>>, vector<1x8x8xf32>,
      %c3_99 = arith.constant 3 : index
      %c0_100 = arith.constant 0 : index
      %c0_101 = arith.constant 0 : index
      %171 = vector.load %arg7[%c3_99, %c0_100, %c0_101] : memref<4x8x1xf32, #tpu.memory_space<vmem>>, vector<1x8x1xf32>
      %172 = vector.shape_cast %171 : vector<1x8x1xf32> to vector<8x1xf32>
      %173 = vector.shape_cast %147 : vector<8x1xf32> to vector<1x8x1xf32>
      tpu.vector_store %arg7[%c3_99, %c0_100, %c0_101], %173 {strides = array<i32>} : memref<4x8x1xf32, #tpu.memory_space<vmem>>, vector<1x8x1xf32>,
    } else {
    }
    %c0_i32_2 = arith.constant 0 : i32
    %6 = arith.cmpi eq, %arg2, %c0_i32_2 : i32
    %7 = arith.extui %6 : i1 to i32
    %c0_i32_3 = arith.constant 0 : i32
    %8 = arith.cmpi ne, %7, %c0_i32_3 : i32
    scf.if %8 {
      %c0 = arith.constant 0 : index
      %c0_4 = arith.constant 0 : index
      %c0_5 = arith.constant 0 : index
      %9 = vector.load %arg8[%c0, %c0_4, %c0_5] : memref<4x8x1xf32, #tpu.memory_space<vmem>>, vector<1x8x1xf32>
      %10 = vector.shape_cast %9 : vector<1x8x1xf32> to vector<8x1xf32>
      %11 = tpu.reciprocal %10 {approx = true} : vector<8x1xf32> -> vector<8x1xf32>
      %c0_6 = arith.constant 0 : index
      %c0_7 = arith.constant 0 : index
      %c0_8 = arith.constant 0 : index
      %12 = vector.load %arg9[%c0_6, %c0_7, %c0_8] : memref<4x8x8xf32, #tpu.memory_space<vmem>>, vector<1x8x8xf32>
      %13 = vector.shape_cast %12 : vector<1x8x8xf32> to vector<8x8xf32>
      %14 = vector.broadcast %11 : vector<8x1xf32> to vector<8x8xf32>
      %15 = arith.mulf %13, %14 : vector<8x8xf32>
      %c0_9 = arith.constant 0 : index
      %c0_10 = arith.constant 0 : index
      %c0_11 = arith.constant 0 : index
      %16 = vector.load %arg6[%c0_9, %c0_10, %c0_11] : memref<1x8x32xf32, #tpu.memory_space<vmem>>, vector<1x8x8xf32>
      %17 = vector.shape_cast %16 : vector<1x8x8xf32> to vector<8x8xf32>
      %18 = vector.shape_cast %15 : vector<8x8xf32> to vector<1x8x8xf32>
      tpu.vector_store %arg6[%c0_9, %c0_10, %c0_11], %18 {strides = array<i32>} : memref<1x8x32xf32, #tpu.memory_space<vmem>>, vector<1x8x8xf32>,
      %c1 = arith.constant 1 : index
      %c0_12 = arith.constant 0 : index
      %c0_13 = arith.constant 0 : index
      %19 = vector.load %arg8[%c1, %c0_12, %c0_13] : memref<4x8x1xf32, #tpu.memory_space<vmem>>, vector<1x8x1xf32>
      %20 = vector.shape_cast %19 : vector<1x8x1xf32> to vector<8x1xf32>
      %21 = tpu.reciprocal %20 {approx = true} : vector<8x1xf32> -> vector<8x1xf32>
      %c1_14 = arith.constant 1 : index
      %c0_15 = arith.constant 0 : index
      %c0_16 = arith.constant 0 : index
      %22 = vector.load %arg9[%c1_14, %c0_15, %c0_16] : memref<4x8x8xf32, #tpu.memory_space<vmem>>, vector<1x8x8xf32>
      %23 = vector.shape_cast %22 : vector<1x8x8xf32> to vector<8x8xf32>
      %24 = vector.broadcast %21 : vector<8x1xf32> to vector<8x8xf32>
      %25 = arith.mulf %23, %24 : vector<8x8xf32>
      %c0_17 = arith.constant 0 : index
      %c0_18 = arith.constant 0 : index
      %c8 = arith.constant 8 : index
      %26 = vector.load %arg6[%c0_17, %c0_18, %c8] : memref<1x8x32xf32, #tpu.memory_space<vmem>>, vector<1x8x8xf32>
      %27 = vector.shape_cast %26 : vector<1x8x8xf32> to vector<8x8xf32>
      %28 = vector.shape_cast %25 : vector<8x8xf32> to vector<1x8x8xf32>
      tpu.vector_store %arg6[%c0_17, %c0_18, %c8], %28 {strides = array<i32>} : memref<1x8x32xf32, #tpu.memory_space<vmem>>, vector<1x8x8xf32>,
      %c2 = arith.constant 2 : index
      %c0_19 = arith.constant 0 : index
      %c0_20 = arith.constant 0 : index
      %29 = vector.load %arg8[%c2, %c0_19, %c0_20] : memref<4x8x1xf32, #tpu.memory_space<vmem>>, vector<1x8x1xf32>
      %30 = vector.shape_cast %29 : vector<1x8x1xf32> to vector<8x1xf32>
      %31 = tpu.reciprocal %30 {approx = true} : vector<8x1xf32> -> vector<8x1xf32>
      %c2_21 = arith.constant 2 : index
      %c0_22 = arith.constant 0 : index
      %c0_23 = arith.constant 0 : index
      %32 = vector.load %arg9[%c2_21, %c0_22, %c0_23] : memref<4x8x8xf32, #tpu.memory_space<vmem>>, vector<1x8x8xf32>
      %33 = vector.shape_cast %32 : vector<1x8x8xf32> to vector<8x8xf32>
      %34 = vector.broadcast %31 : vector<8x1xf32> to vector<8x8xf32>
      %35 = arith.mulf %33, %34 : vector<8x8xf32>
      %c0_24 = arith.constant 0 : index
      %c0_25 = arith.constant 0 : index
      %c16 = arith.constant 16 : index
      %36 = vector.load %arg6[%c0_24, %c0_25, %c16] : memref<1x8x32xf32, #tpu.memory_space<vmem>>, vector<1x8x8xf32>
      %37 = vector.shape_cast %36 : vector<1x8x8xf32> to vector<8x8xf32>
      %38 = vector.shape_cast %35 : vector<8x8xf32> to vector<1x8x8xf32>
      tpu.vector_store %arg6[%c0_24, %c0_25, %c16], %38 {strides = array<i32>} : memref<1x8x32xf32, #tpu.memory_space<vmem>>, vector<1x8x8xf32>,
      %c3 = arith.constant 3 : index
      %c0_26 = arith.constant 0 : index
      %c0_27 = arith.constant 0 : index
      %39 = vector.load %arg8[%c3, %c0_26, %c0_27] : memref<4x8x1xf32, #tpu.memory_space<vmem>>, vector<1x8x1xf32>
      %40 = vector.shape_cast %39 : vector<1x8x1xf32> to vector<8x1xf32>
      %41 = tpu.reciprocal %40 {approx = true} : vector<8x1xf32> -> vector<8x1xf32>
      %c3_28 = arith.constant 3 : index
      %c0_29 = arith.constant 0 : index
      %c0_30 = arith.constant 0 : index
      %42 = vector.load %arg9[%c3_28, %c0_29, %c0_30] : memref<4x8x8xf32, #tpu.memory_space<vmem>>, vector<1x8x8xf32>
      %43 = vector.shape_cast %42 : vector<1x8x8xf32> to vector<8x8xf32>
      %44 = vector.broadcast %41 : vector<8x1xf32> to vector<8x8xf32>
      %45 = arith.mulf %43, %44 : vector<8x8xf32>
      %c0_31 = arith.constant 0 : index
      %c0_32 = arith.constant 0 : index
      %c24 = arith.constant 24 : index
      %46 = vector.load %arg6[%c0_31, %c0_32, %c24] : memref<1x8x32xf32, #tpu.memory_space<vmem>>, vector<1x8x8xf32>
      %47 = vector.shape_cast %46 : vector<1x8x8xf32> to vector<8x8xf32>
      %48 = vector.shape_cast %45 : vector<8x8xf32> to vector<1x8x8xf32>
      tpu.vector_store %arg6[%c0_31, %c0_32, %c24], %48 {strides = array<i32>} : memref<1x8x32xf32, #tpu.memory_space<vmem>>, vector<1x8x8xf32>,
    } else {
    }
    return
  }
  func.func @transform_0(%arg0: i32, %arg1: i32, %arg2: i32) -> (i32, i32, i32) {
    %c0_i32 = arith.constant 0 : i32
    %c0_i32_0 = arith.constant 0 : i32
    return %arg0, %arg1, %c0_i32 : i32, i32, i32
  }
  func.func @transform_1(%arg0: i32, %arg1: i32, %arg2: i32) -> (i32, i32, i32) {
    %0 = arith.minsi %arg2, %arg1 : i32
    %c0_i32 = arith.constant 0 : i32
    %c0_i32_0 = arith.constant 0 : i32
    return %arg0, %0, %c0_i32 : i32, i32, i32
  }
  func.func @transform_2(%arg0: i32, %arg1: i32, %arg2: i32) -> (i32, i32, i32) {
    %0 = arith.minsi %arg2, %arg1 : i32
    %c0_i32 = arith.constant 0 : i32
    %c0_i32_0 = arith.constant 0 : i32
    return %arg0, %0, %c0_i32 : i32, i32, i32
  }
  func.func @transform_3(%arg0: i32, %arg1: i32, %arg2: i32) -> (i32, i32, i32) {
    %c0_i32 = arith.constant 0 : i32
    %c0_i32_0 = arith.constant 0 : i32
    return %arg0, %arg1, %c0_i32 : i32, i32, i32
  }
}

</mosaic_0001>

<bundles_post_ra>
// kernel: attention_forward.3
= control target key start
LH: loop header
LB: loop body
LE: loop exit
PB: predicated region body
PF: predicated region fallthrough
CT: control target
= control target key end

     0   :  { %s308_s1 = inlined_call_operand.vmem [shape: f32[128,128], index: 1, kind: input, shape index: {}]   ;;  %s309_s0 = inlined_call_operand.vmem [shape: f32[16,128], index: 0, kind: input, shape index: {}]   ;;  %s310_s2 = inlined_call_operand.vmem [shape: f32[1,128], index: 2, kind: input, shape index: {}]   ;;  %s311_s3 = inlined_call_operand.vmem [shape: f32[16,128], index: 3, kind: output, shape index: {}]  }
   0x1   :  { %v24_v0 = vld [vmem:[%s308_s1] sm:$0xff]  ;;  %v25_v1 = vld [vmem:[%s308_s1 + $0x8] sm:$0xff]  ;;  %v26_v2 = vld [vmem:[%s308_s1 + $0x10] sm:$0xff] }
   0x2   :  { %v193_v3 = vpack.c.bf16 %v25_v1, %v24_v0  ;;  %v27_v4 = vld [vmem:[%s308_s1 + $0x18] sm:$0xff]  ;;  %v28_v6 = vld [vmem:[%s308_s1 + $0x20] sm:$0xff]  ;;  %v29_v7 = vld [vmem:[%s308_s1 + $0x28] sm:$0xff] }
   0x3   :  { %v197_v5 = vpack.c.bf16 %v27_v4, %v26_v2  ;;  %v201_v8 = vpack.c.bf16 %v29_v7, %v28_v6  ;;  %v22_v9 = vld [vmem:[%s309_s0] sm:$0xff]  ;;  %v30_v10 = vld [vmem:[%s308_s1 + $0x30] sm:$0xff]  ;;  %v31_v11 = vld [vmem:[%s308_s1 + $0x38] sm:$0xff] }
   0x4   :  { %194 = vmatprep.subr.bf16.mxu0 %v193_v3  ;;  %190 = vmatprep.mubr.f32.mxu0 %v22_v9  ;;  %v205_v12 = vpack.c.bf16 %v31_v11, %v30_v10  ;;  %v32_v13 = vld [vmem:[%s308_s1 + $0x40] sm:$0xff]  ;;  %v33_v14 = vld [vmem:[%s308_s1 + $0x48] sm:$0xff]  ;;  %v34_v16 = vld [vmem:[%s308_s1 + $0x50] sm:$0xff] }
   0x5   :  { %196 = vmatpush3.bf16.msra.mxu0 %v193_v3  ;;  %v209_v15 = vpack.c.bf16 %v33_v14, %v32_v13  ;;  %v35_v17 = vld [vmem:[%s308_s1 + $0x58] sm:$0xff]  ;;  %v36_v19 = vld [vmem:[%s308_s1 + $0x60] sm:$0xff]  ;;  %v37_v20 = vld [vmem:[%s308_s1 + $0x68] sm:$0xff] }
   0x6   :  { %198 = vmatprep.subr.bf16.mxu0 %v197_v5  ;;  %v213_v18 = vpack.c.bf16 %v35_v17, %v34_v16  ;;  %v217_v21 = vpack.c.bf16 %v37_v20, %v36_v19  ;;  %v38_v22 = vld [vmem:[%s308_s1 + $0x70] sm:$0xff]  ;;  %v39_v23 = vld [vmem:[%s308_s1 + $0x78] sm:$0xff]  ;;  %v23_v25 = vld [vmem:[%s309_s0 + $0x8] sm:$0xff] }
   0x7   :  { %v221_v24 = vpack.c.bf16 %v39_v23, %v38_v22  ;;  %v139_v26 = vld [vmem:[%s310_s2] ss:$0 sm:$0xff] }
   0x9   :  { %200 = vmatpush3.bf16.msra.mxu0 %v197_v5 }
   0xa   :  { %202 = vmatprep.subr.bf16.mxu0 %v201_v8 }
   0xd   :  { %204 = vmatpush3.bf16.msra.mxu0 %v201_v8 }
   0xe   :  { %206 = vmatprep.subr.bf16.mxu0 %v205_v12 }
  0x11   :  { %208 = vmatpush3.bf16.msra.mxu0 %v205_v12 }
  0x12   :  { %210 = vmatprep.subr.bf16.mxu0 %v209_v15 }
  0x15   :  { %212 = vmatpush3.bf16.msra.mxu0 %v209_v15 }
  0x16   :  { %214 = vmatprep.subr.bf16.mxu0 %v213_v18 }
  0x19   :  { %216 = vmatpush3.bf16.msra.mxu0 %v213_v18 }
  0x1a   :  { %218 = vmatprep.subr.bf16.mxu0 %v217_v21 }
  0x1d   :  { %220 = vmatpush3.bf16.msra.mxu0 %v217_v21 }
  0x1e   :  { %222 = vmatprep.subr.bf16.mxu0 %v221_v24 }
  0x21   :  { %224 = vmatpush3.bf16.msra.mxu0 %v221_v24 }
  0x24   :  { %191 = vmatmul.mubr.f32.vlgmr.msra.gmra.mrb[0].mxu0 %v23_v25 }
  0xf7   :  { %v192_v27 = vpop.f32.mrb[0].mxu0 }
  0xf8   :  { %v132_v28 = vadd.f32 %v192_v27, %v139_v26  ;;  %v106_v29 = vpop.f32.mrb[1].mxu0 }
  0xf9   :  { %v131_v30 = vadd.f32 %v139_v26, %v106_v29 }
  0xfa   :  { %134 = vst [vmem:[%s311_s3 + $0x8] sm:$0xff] %v132_v28 }
  0xfb   :  { %133 = vst [vmem:[%s311_s3] sm:$0xff] %v131_v30 }

// kernel: attention_forward.4
= control target key start
LH: loop header
LB: loop body
LE: loop exit
PB: predicated region body
PF: predicated region fallthrough
CT: control target
= control target key end

     0   :  { %s1449_s12 = smov 0   ;;  %s1451_s13 = smov 0   ;;  %s1617_s0 = inlined_call_operand.vmem [shape: f32[2,8,32], index: 0, kind: input, shape index: {}]   ;;  %s1618_s1 = inlined_call_operand.vmem [shape: f32[2,8,32], index: 1, kind: input, shape index: {}]   ;;  %s1619_s2 = inlined_call_operand.vmem [shape: f32[2,8,32], index: 2, kind: input, shape index: {}]   ;;  %s1620_s3 = inlined_call_operand.vmem [shape: f32[2,8,32], index: 3, kind: output, shape index: {}]  }
   0x1   :  { %s1453_s14 = smov 0  }
   0x2 LB: > { %s32_s15 = sadd.s32 1, %s1413_s13  ;;  %p1260_p0 = scmp.ge.s32.totalorder %s1417_s14, 1  ;;  %s1417_s14 = sphi %s1453_s14, %s13_s14   ;;  %s1413_s13 = sphi %s1451_s13, %s1622_s13   ;;  %s1409_s12 = sphi %s1449_s12, %s1621_s12  }
   0x3   : > { %p34_p1 = scmp.ge.s32.totalorder %s32_s15, 2  ;;  %p206_p2 = scmp.lt.s32.totalorder %s1417_s14, 3 }
   0x5   : > { %s1624_s15 = smov (%p34_p1, %s32_s15), 0  ;;  %p207_p3 = pnand %p1260_p0, %p206_p2 }
   0x6   : > { %p252_p4 = scmp.lt.s32.totalorder (!%p207_p3), %s1409_s12, 1  ;;  %vm301_vm0 = vcmask (!%p207_p3), 64512   ;;  %v1419_v0 = vmov (!%p207_p3), 0.0   ;;  %vm1420_vm1 = vmmov (!%p207_p3), 0   ;;  %vm292_vm2 = vcmask (!%p207_p3), 7168   ;;  %s1423_s23 = smov (!%p207_p3), 120  }
   0x7   : > { %210 = sbr.rel (%p207_p3) target bundleno = 1445 (0x5a5), region = 32  ;;  %1295 = vmatprep.subr.mxu0 (!%p207_p3), %v1419_v0  ;;  %302 = vst.msk [vmem:[#allocation4] sm:$0xff] (!%p207_p3), %vm301_vm0, %v1419_v0  ;;  %303 = vst.msk [vmem:[#allocation4 + $0x8] sm:$0xff] (!%p207_p3), %vm301_vm0, %v1419_v0  ;;  %1297 = vmatprep.mubr.msk.f32.mxu0 (!%p207_p3), %vm1420_vm1, %v1419_v0  ;;  %v1421_v4 = vmov (!%p207_p3), -inf   ;;  %v315_v5 = vlaneseq (!%p207_p3)  ;;  %v1422_v12 = vmov (!%p207_p3), 0   ;;  %s1424_s24 = smov (!%p207_p3), 112  }
   0x8   : > { %304 = vst.msk [vmem:[#allocation4 + $0x10] sm:$0xff] (!%p207_p3), %vm301_vm0, %v1419_v0  ;;  %305 = vst.msk [vmem:[#allocation4 + $0x18] sm:$0xff] (!%p207_p3), %vm301_vm0, %v1419_v0  ;;  %1300 = vmatprep.subr.mxu1 (!%p207_p3), %v1419_v0  ;;  %1302 = vmatprep.mubr.msk.f32.mxu1 (!%p207_p3), %vm1420_vm1, %v1419_v0  ;;  %s1425_s25 = smov (!%p207_p3), 104   ;;  %s1426_s29 = smov (!%p207_p3), 8   ;;  %vm1113_vm4 = vcmask (!%p207_p3), 130112   ;;  %vm1130_vm5 = vcmask (!%p207_p3), 195712  }
   0x9   : > { %293 = vst.msk [vmem:[#allocation2] sm:$0xff] (!%p207_p3), %vm292_vm2, %v1421_v4  ;;  %294 = vst.msk [vmem:[#allocation2 + $0x8] sm:$0xff] (!%p207_p3), %vm292_vm2, %v1421_v4  ;;  %v1508_v6 = vshrl.u32 (!%p207_p3), %v315_v5, 7  ;;  %v1510_v7 = vand.u32 (!%p207_p3), 127, %v315_v5  ;;  %1369 = vset.pattern.permute.xlu0 (!%p207_p3), %v1422_v12  ;;  %1370 = vset.pattern.permute.xlu1 (!%p207_p3), %v1422_v12  ;;  %s1427_s6 = smov (!%p207_p3), 16   ;;  %s1428_s7 = smov (!%p207_p3), 24  }
   0xa   : > { %295 = vst.msk [vmem:[#allocation2 + $0x10] sm:$0xff] (!%p207_p3), %vm292_vm2, %v1421_v4  ;;  %296 = vst.msk [vmem:[#allocation2 + $0x18] sm:$0xff] (!%p207_p3), %vm292_vm2, %v1421_v4  ;;  %vm1147_vm6 = vcmask (!%p207_p3), 261312  }
   0xb   : > { %297 = vst.msk [vmem:[#allocation3] sm:$0xff] (!%p207_p3), %vm292_vm2, %v1419_v0  ;;  %298 = vst.msk [vmem:[#allocation3 + $0x8] sm:$0xff] (!%p207_p3), %vm292_vm2, %v1419_v0  ;;  %vm324_vm3 = vcmp.le.s32.totalorder (!%p207_p3), %v1510_v7, %v1508_v6 }
   0xc   : > { %299 = vst.msk [vmem:[#allocation3 + $0x10] sm:$0xff] (!%p207_p3), %vm292_vm2, %v1419_v0  ;;  %300 = vst.msk [vmem:[#allocation3 + $0x18] sm:$0xff] (!%p207_p3), %vm292_vm2, %v1419_v0 }
   0xe   : > { %s1626_s12 = smov (!%p252_p4, %s1409_s12), 1 }
   0xf   : > { %s1481_s16 = sshll.u32 %s1626_s12, 3 }
  0x10   : > { %s267_s19 = scalar_lea.vmem %s1618_s1, %s1481_s16  ;;  %s258_s22 = scalar_lea.vmem %s1617_s0, %s1481_s16  ;;  %v1524_v13 = vld [vmem:[#allocation2] sm:$0xff]  ;;  %v590_v42 = vld [vmem:[#allocation2 + $0x8] sm:$0xff] }
  0x11   : > { %v312_v1 = vld [vmem:[%s267_s19] sm:$0xff]  ;;  %s278_s28 = scalar_lea.vmem %s1619_s2, %s1481_s16  ;;  %v782_v45 = vld [vmem:[#allocation2 + $0x10] sm:$0xff]  ;;  %v973_v49 = vld [vmem:[#allocation2 + $0x18] sm:$0xff]  ;;  %s287_s5 = scalar_lea.vmem %s1620_s3, %s1481_s16 }
  0x12   : > { %v310_v2 = vld [vmem:[%s258_s22] sm:$0xff]  ;;  %1296 = vmatpush3.xpose.msk.msra.mxu0 %vm301_vm0, %v312_v1  ;;  %512 = vrot.lane.b32.xlu1 %v312_v1, %s1423_s23 }
  0x13   : > { %v311_v3 = vmul.f32 0.35355338, %v310_v2  ;;  %1310 = vmatprep.subr.mxu0 %v1419_v0  ;;  %v313_v17 = vld [vmem:[%s278_s28] sm:$0xff] }
  0x14   : > { %1301 = vmatpush3.msra.mxu1 %v313_v17 }
  0x15   : > { %1298 = vmatmul.mubr.msk.f32.vlgmr.msra.gmra.mrb[0].mxu0 %vm301_vm0, %v311_v3  ;;  %1305 = vmatprep.subr.mxu1 %v1419_v0 }
  0x16   : > { %1312 = vmatprep.mubr.msk.f32.mxu0 %vm1420_vm1, %v1419_v0  ;;  %510 = vrot.lane.b32.xlu1 %v311_v3, %s1423_s23 }
  0x1a   : > { %704 = vrot.lane.b32.xlu1 %v312_v1, %s1424_s24 }
  0x1e   : > { %702 = vrot.lane.b32.xlu1 %v311_v3, %s1424_s24 }
  0x22   : > { %895 = vrot.lane.b32.xlu1 %v312_v1, %s1425_s25 }
  0x26   : > { %893 = vrot.lane.b32.xlu1 %v311_v3, %s1425_s25 }
  0x84   : > { %v513_v18 = vpop.permute.xlu1 %512 }
  0x88   : > { %v511_v21 = vpop.permute.xlu1 %510 }
  0x8c   : > { %v705_v23 = vpop.permute.xlu1 %704 }
  0x90   : > { %v703_v24 = vpop.permute.xlu1 %702 }
  0x94   : > { %v896_v26 = vpop.permute.xlu1 %895 }
  0x98   : > { %v894_v27 = vpop.permute.xlu1 %893 }
  0xe8   : > { %v398_v8 = vpop.f32.mrb[0].mxu0 }
  0xe9   : > { %v402_v9 = vsel %vm324_vm3, %v398_v8, -1e+30  ;;  %v1299_v10 = vpop.f32.mrb[1].mxu0 }
  0xea   : > { %v404_v11 = vsel %vm301_vm0, %v402_v9, -inf }
  0xeb   : > { %405 = vmax.xlane.f32.xlu0 %v404_v11 }
 0x178   : > { %v406_v14 = vpop.xlane.xlu0 %405 }
 0x179   : > { %v1527_v15 = vmax.f32 %v1524_v13, %v406_v14 }
 0x17b   : > { %v408_v16 = vsub.f32 %v1524_v13, %v1527_v15  ;;  %509 = vst.msk [vmem:[#allocation2] sm:$0xff] %vm292_vm2, %v1527_v15  ;;  %413 = vperm.xlu0 %1369, %v1527_v15  }
 0x17d   : > { %v409_v12 = vmul.f32 1.442695, %v408_v16 }
 0x1fa   : > { %v414_v19 = vpop.permute.xlu0 %413 }
 0x1fb   : > { %v416_v20 = vsub.f32 %v402_v9, %v414_v19 }
 0x1fd   : > { %v417_v22 = vmul.f32 1.442695, %v416_v20  ;;  %v607_v20 = vld [vmem:[#allocation3 + $0x8] sm:$0xff] }
 0x1ff   : > { %1371 = vpow2.f32 %v417_v22 }
 0x209   : > { %v1539_v25 = vpop.eup %1371 }
 0x20a   : > { %1303 = vmatmul.mubr.msk.f32.vlgmr.msra.gmra.mrb[0].mxu1 %vm301_vm0, %v1539_v25  ;;  %v421_v6 = vsel %vm301_vm0, %v1539_v25, 0.0 }
 0x20b   : > { %1306 = vmatpush3.xpose.msk.msra.mxu1 %vm301_vm0, %v513_v18  ;;  %1307 = vmatprep.mubr.msk.f32.mxu1 %vm1420_vm1, %v1419_v0 }
 0x20c   : > { %1315 = vmatprep.subr.mxu1 %v1419_v0 }
 0x20e   : > { %1308 = vmatmul.mubr.msk.f32.vlgmr.msra.gmra.mrb[2].mxu1 %vm301_vm0, %v511_v21 }
 0x20f   : > { %1316 = vmatpush3.xpose.msk.msra.mxu1 %vm301_vm0, %v705_v23  ;;  %1317 = vmatprep.mubr.msk.f32.mxu1 %vm1420_vm1, %v1419_v0  ;;  %v799_v23 = vld [vmem:[#allocation3 + $0x10] sm:$0xff] }
 0x210   : > { %1325 = vmatprep.subr.mxu1 %v1419_v0 }
 0x212   : > { %1318 = vmatmul.mubr.msk.f32.vlgmr.msra.gmra.mrb[4].mxu1 %vm301_vm0, %v703_v24  ;;  %v419_v24 = vld [vmem:[#allocation3] sm:$0xff] }
 0x213   : > { %1326 = vmatpush3.xpose.msk.msra.mxu1 %vm301_vm0, %v896_v26  ;;  %1327 = vmatprep.mubr.msk.f32.mxu1 %vm1420_vm1, %v1419_v0 }
 0x216   : > { %1328 = vmatmul.mubr.msk.f32.vlgmr.msra.gmra.mrb[6].mxu1 %vm301_vm0, %v894_v27  ;;  %v990_v27 = vld [vmem:[#allocation3 + $0x18] sm:$0xff] }
 0x2dd   : > { %v1557_v28 = vpop.f32.mrb[0].mxu1 }
 0x2de   : > { %v1304_v29 = vpop.f32.mrb[1].mxu1 }
 0x2e1   : > { %v584_v30 = vpop.f32.mrb[2].mxu1 }
 0x2e2   : > { %v588_v31 = vsel %vm324_vm3, %v584_v30, -1e+30  ;;  %v1309_v32 = vpop.f32.mrb[3].mxu1 }
 0x2e3   : > { %v591_v33 = vsel %vm301_vm0, %v588_v31, -inf }
 0x2e4   : > { %592 = vmax.xlane.f32.xlu1 %v591_v33 }
 0x2e5   : > { %v776_v34 = vpop.f32.mrb[4].mxu1 }
 0x2e6   : > { %v780_v35 = vsel %vm324_vm3, %v776_v34, -1e+30  ;;  %v1319_v36 = vpop.f32.mrb[5].mxu1 }
 0x2e7   : > { %v783_v37 = vsel %vm301_vm0, %v780_v35, -inf }
 0x2e8   : > { %784 = vmax.xlane.f32.xlu0 %v783_v37 }
 0x2e9   : > { %v967_v38 = vpop.f32.mrb[6].mxu1 }
 0x2ea   : > { %v971_v39 = vsel %vm324_vm3, %v967_v38, -1e+30  ;;  %v1329_v40 = vpop.f32.mrb[7].mxu1 }
 0x2eb   : > { %v974_v41 = vsel %vm301_vm0, %v971_v39, -inf }
 0x2ec   : > { %975 = vmax.xlane.f32.xlu1 %v974_v41 }
 0x371   : > { %v593_v43 = vpop.xlane.xlu1 %592 }
 0x372   : > { %v594_v44 = vmax.f32 %v590_v42, %v593_v43 }
 0x374   : > { %v595_v46 = vsub.f32 %v590_v42, %v594_v44  ;;  %701 = vst.msk [vmem:[#allocation2 + $0x8] sm:$0xff] %vm292_vm2, %v594_v44  ;;  %600 = vperm.xlu1 %1370, %v594_v44  }
 0x375   : > { %v785_v47 = vpop.xlane.xlu0 %784 }
 0x376   : > { %v786_v48 = vmax.f32 %v782_v45, %v785_v47  ;;  %v596_v9 = vmul.f32 1.442695, %v595_v46  ;;  %v692_v47 = vld [vmem:[#allocation4 + $0x8] sm:$0xff] }
 0x378   : > { %v787_v50 = vsub.f32 %v782_v45, %v786_v48  ;;  %892 = vst.msk [vmem:[#allocation2 + $0x10] sm:$0xff] %vm292_vm2, %v786_v48  ;;  %792 = vperm.xlu0 %1369, %v786_v48  }
 0x379   : > { %v976_v51 = vpop.xlane.xlu1 %975 }
 0x37a   : > { %v977_v52 = vmax.f32 %v973_v49, %v976_v51  ;;  %v788_v11 = vmul.f32 1.442695, %v787_v50 }
 0x37c   : > { %v978_v53 = vsub.f32 %v973_v49, %v977_v52  ;;  %1083 = vst.msk [vmem:[#allocation2 + $0x18] sm:$0xff] %vm292_vm2, %v977_v52  ;;  %983 = vperm.xlu1 %1370, %v977_v52   ;;  %v883_v49 = vld [vmem:[#allocation4 + $0x10] sm:$0xff] }
 0x37e   : > { %v979_v14 = vmul.f32 1.442695, %v978_v53 }
 0x380   : > { %615 = vrot.lane.b32.xlu1 %v313_v17, %s1423_s23 }
 0x384   : > { %806 = vrot.lane.b32.xlu1 %v313_v17, %s1424_s24 }
 0x388   : > { %997 = vrot.lane.b32.xlu1 %v313_v17, %s1425_s25 }
 0x3f3   : > { %v601_v54 = vpop.permute.xlu1 %600 }
 0x3f4   : > { %v603_v55 = vsub.f32 %v588_v31, %v601_v54  ;;  %v1074_v54 = vld [vmem:[#allocation4 + $0x18] sm:$0xff] }
 0x3f6   : > { %v604_v56 = vmul.f32 1.442695, %v603_v55 }
 0x3f7   : > { %v793_v57 = vpop.permute.xlu0 %792 }
 0x3f8   : > { %1373 = vpow2.f32 %v604_v56  ;;  %v795_v58 = vsub.f32 %v780_v35, %v793_v57  ;;  %v500_v35 = vld [vmem:[#allocation4] sm:$0xff] }
 0x3fa   : > { %v796_v59 = vmul.f32 1.442695, %v795_v58 }
 0x3fb   : > { %v984_v60 = vpop.permute.xlu1 %983 }
 0x3fc   : > { %1375 = vpow2.f32 %v796_v59  ;;  %v986_v61 = vsub.f32 %v971_v39, %v984_v60 }
 0x3fe   : > { %v987_v62 = vmul.f32 1.442695, %v986_v61 }
 0x3ff   : > { %v616_v63 = vpop.permute.xlu1 %615 }
 0x400   : > { %1377 = vpow2.f32 %v987_v62  ;;  %1311 = vmatpush3.msra.mxu0 %v616_v63 }
 0x401   : > { %1320 = vmatprep.subr.mxu0 %v1419_v0  ;;  %1379 = vpow2.f32 %v596_v9 }
 0x402   : > { %v1374_v1 = vpop.eup %1373  ;;  %1381 = vpow2.f32 %v788_v11 }
 0x403   : > { %1313 = vmatmul.mubr.msk.f32.vlgmr.msra.gmra.mrb[2].mxu0 %vm301_vm0, %v1374_v1  ;;  %v609_v2 = vsel %vm301_vm0, %v1374_v1, 0.0  ;;  %v807_v3 = vpop.permute.xlu1 %806  ;;  %1383 = vpow2.f32 %v409_v12 }
 0x404   : > { %610 = vadd.xlane.f32.xlu1 %v609_v2  ;;  %1321 = vmatpush3.msra.mxu0 %v807_v3  ;;  %1385 = vpow2.f32 %v979_v14 }
 0x405   : > { %1322 = vmatprep.mubr.msk.f32.mxu0 %vm1420_vm1, %v1419_v0  ;;  %1330 = vmatprep.subr.mxu0 %v1419_v0 }
 0x406   : > { %v1376_v4 = vpop.eup %1375 }
 0x407   : > { %1323 = vmatmul.mubr.msk.f32.vlgmr.msra.gmra.mrb[4].mxu0 %vm301_vm0, %v1376_v4  ;;  %v801_v5 = vsel %vm301_vm0, %v1376_v4, 0.0  ;;  %v998_v7 = vpop.permute.xlu1 %997 }
 0x408   : > { %802 = vadd.xlane.f32.xlu0 %v801_v5  ;;  %422 = vadd.xlane.f32.xlu1 %v421_v6 }
 0x409   : > { %1331 = vmatpush3.msra.mxu0 %v998_v7  ;;  %1332 = vmatprep.mubr.msk.f32.mxu0 %vm1420_vm1, %v1419_v0 }
 0x40a   : > { %v1378_v8 = vpop.eup %1377 }
 0x40b   : > { %1333 = vmatmul.mubr.msk.f32.vlgmr.msra.gmra.mrb[6].mxu0 %vm301_vm0, %v1378_v8  ;;  %v992_v10 = vsel %vm301_vm0, %v1378_v8, 0.0  ;;  %v1380_v17 = vpop.eup %1379 }
 0x40c   : > { %993 = vadd.xlane.f32.xlu0 %v992_v10  ;;  %v1382_v0 = vpop.eup %1381  ;;  %v608_v21 = vmul.f32 %v1380_v17, %v607_v20 }
 0x40d   : > { %v1384_v18 = vpop.eup %1383  ;;  %v800_v13 = vmul.f32 %v1382_v0, %v799_v23 }
 0x40e   : > { %v1386_v19 = vpop.eup %1385  ;;  %v420_v15 = vmul.f32 %v1384_v18, %v419_v24 }
 0x40f   : > { %v991_v31 = vmul.f32 %v1386_v19, %v990_v27 }
 0x419   : > { %695 = vperm.xlu1 %1370, %v1380_v17  }
 0x41d   : > { %886 = vperm.xlu1 %1370, %v1382_v0  }
 0x422   : > { %503 = vperm.xlu0 %1369, %v1384_v18  }
 0x426   : > { %1077 = vperm.xlu0 %1369, %v1386_v19  }
 0x491   : > { %v611_v22 = vpop.xlane.xlu1 %610 }
 0x492   : > { %v612_v25 = vadd.f32 %v611_v22, %v608_v21 }
 0x494   : > { %613 = vst.msk [vmem:[#allocation3 + $0x8] sm:$0xff] %vm292_vm2, %v612_v25 }
 0x495   : > { %v803_v16 = vpop.xlane.xlu0 %802  ;;  %v423_v26 = vpop.xlane.xlu1 %422 }
 0x496   : > { %v804_v29 = vadd.f32 %v803_v16, %v800_v13  ;;  %v424_v30 = vadd.f32 %v423_v26, %v420_v15 }
 0x498   : > { %805 = vst.msk [vmem:[#allocation3 + $0x10] sm:$0xff] %vm292_vm2, %v804_v29  ;;  %426 = vst.msk [vmem:[#allocation3] sm:$0xff] %vm292_vm2, %v424_v30 }
 0x499   : > { %v994_v32 = vpop.xlane.xlu0 %993  ;;  %v696_v46 = vpop.permute.xlu1 %695 }
 0x49a   : > { %v995_v33 = vadd.f32 %v994_v32, %v991_v31  ;;  %v698_v48 = vmul.f32 %v696_v46, %v692_v47 }
 0x49b   : > { %v1099_v34 = vld [vmem:[#allocation3 + $0x8] sm:$0xff] }
 0x49c   : > { %996 = vst.msk [vmem:[#allocation3 + $0x18] sm:$0xff] %vm292_vm2, %v995_v33  ;;  %1387 = vrcp.f32 %v1099_v34 }
 0x49d   : > { %v887_v50 = vpop.permute.xlu1 %886 }
 0x49f   : > { %v1116_v36 = vld [vmem:[#allocation3 + $0x10] sm:$0xff]  ;;  %v1087_v37 = vld [vmem:[#allocation3] sm:$0xff] }
 0x4a0   : > { %1389 = vrcp.f32 %v1116_v36 }
 0x4a1   : > { %v504_v38 = vpop.permute.xlu0 %503  ;;  %1391 = vrcp.f32 %v1087_v37 }
 0x4a2   : > { %v506_v39 = vmul.f32 %v504_v38, %v500_v35 }
 0x4a3   : > { %v1133_v40 = vld [vmem:[#allocation3 + $0x18] sm:$0xff] }
 0x4a4   : > { %v507_v41 = vadd.f32 %v506_v39, %v1557_v28  ;;  %1393 = vrcp.f32 %v1133_v40  ;;  %v889_v28 = vmul.f32 %v887_v50, %v883_v49 }
 0x4a5   : > { %v1078_v55 = vpop.permute.xlu0 %1077 }
 0x4a6   : > { %v1388_v42 = vpop.eup %1387  ;;  %508 = vst.msk [vmem:[#allocation4] sm:$0xff] %vm301_vm0, %v507_v41  ;;  %v1080_v59 = vmul.f32 %v1078_v55, %v1074_v54 }
 0x4a7   : > { %1105 = vperm.xlu0 %1369, %v1388_v42  }
 0x4aa   : > { %v1390_v43 = vpop.eup %1389 }
 0x4ab   : > { %v1392_v44 = vpop.eup %1391  ;;  %1122 = vperm.xlu0 %1369, %v1390_v43  }
 0x4ac   : > { %1092 = vperm.xlu1 %1370, %v1392_v44  }
 0x4ad   : > { %v1089_v6 = vld [vmem:[#allocation4] sm:$0xff] }
 0x4ae   : > { %v1394_v45 = vpop.eup %1393 }
 0x4af   : > { %1139 = vperm.xlu0 %1369, %v1394_v45  }
 0x4d6   : > { %v687_v51 = vpop.f32.mrb[2].mxu0 }
 0x4d7   : > { %v699_v52 = vadd.f32 %v698_v48, %v687_v51  ;;  %v1314_v53 = vpop.f32.mrb[3].mxu0 }
 0x4d9   : > { %700 = vst.msk [vmem:[#allocation4 + $0x8] sm:$0xff] %vm301_vm0, %v699_v52 }
 0x4da   : > { %v878_v56 = vpop.f32.mrb[4].mxu0 }
 0x4db   : > { %v890_v57 = vadd.f32 %v889_v28, %v878_v56  ;;  %v1324_v58 = vpop.f32.mrb[5].mxu0 }
 0x4dd   : > { %891 = vst.msk [vmem:[#allocation4 + $0x10] sm:$0xff] %vm301_vm0, %v890_v57 }
 0x4de   : > { %v1069_v60 = vpop.f32.mrb[6].mxu0 }
 0x4df   : > { %v1081_v61 = vadd.f32 %v1080_v59, %v1069_v60  ;;  %v1334_v62 = vpop.f32.mrb[7].mxu0 }
 0x4e0   : > { %v1102_v1 = vld [vmem:[#allocation4 + $0x8] sm:$0xff] }
 0x4e1   : > { %1082 = vst.msk [vmem:[#allocation4 + $0x18] sm:$0xff] %vm301_vm0, %v1081_v61 }
 0x4e4   : > { %v1119_v4 = vld [vmem:[#allocation4 + $0x10] sm:$0xff] }
 0x4e8   : > { %v1136_v10 = vld [vmem:[#allocation4 + $0x18] sm:$0xff] }
 0x526   : > { %v1106_v63 = vpop.permute.xlu0 %1105 }
 0x527   : > { %v1108_v2 = vmul.f32 %v1106_v63, %v1102_v1 }
 0x529   : > { %1110 = vrot.lane.b32.xlu1 %v1108_v2, %s1426_s29 }
 0x52a   : > { %v1123_v3 = vpop.permute.xlu0 %1122 }
 0x52b   : > { %v1125_v5 = vmul.f32 %v1123_v3, %v1119_v4  ;;  %v1093_v7 = vpop.permute.xlu1 %1092 }
 0x52c   : > { %v1095_v8 = vmul.f32 %v1093_v7, %v1089_v6 }
 0x52d   : > { %1127 = vrot.lane.b32.xlu1 %v1125_v5, %s1427_s6 }
 0x52e   : > { %1097 = vst.msk [vmem:[%s287_s5] sm:$0xff] %vm301_vm0, %v1095_v8  ;;  %v1140_v9 = vpop.permute.xlu0 %1139 }
 0x52f   : > { %v1142_v11 = vmul.f32 %v1140_v9, %v1136_v10 }
 0x531   : > { %1144 = vrot.lane.b32.xlu1 %v1142_v11, %s1428_s7 }
 0x59b   : > { %v1111_v12 = vpop.permute.xlu1 %1110 }
 0x59c   : > { %1114 = vst.msk [vmem:[%s287_s5] sm:$0xff] %vm1113_vm4, %v1111_v12 }
 0x59f   : > { %v1128_v14 = vpop.permute.xlu1 %1127 }
 0x5a0   : > { %1131 = vst.msk [vmem:[%s287_s5] sm:$0xff] %vm1130_vm5, %v1128_v14 }
 0x5a3   : > { %v1145_v17 = vpop.permute.xlu1 %1144 }
 0x5a4   : > { %1148 = vst.msk [vmem:[%s287_s5] sm:$0xff] %vm1147_vm6, %v1145_v17 }
 0x5a5 PF: > { %s13_s14 = sadd.s32 1, %s1417_s14   ;;  %s1621_s12 = smov %s1413_s13 }
 0x5a6   : > { %p10_p5 = scmp.ge.s32.totalorder %s13_s14, 4   ;;  %s1622_s13 = smov %s1624_s15 }
 0x5a8   :  { %12 = sbr.rel (!%p10_p5) target bundleno = 2 (0x2), region = 95 }

</bundles_post_ra>
